<compile_context>
chip_gen: v6e
topology: v6e:2x2x1
jax: 0.10.0
libtpu: 0.0.40
codegen_flags: <defaults>
</compile_context>

<pallas_src>
import functools

import jax
import jax.numpy as jnp
from jax.experimental import pallas as pl
from jax.experimental.pallas import tpu as pltpu


def _round_up(x, m):
    return (x + m - 1) // m * m


def _pick_tile(dim_p, pref):
    """Largest multiple of 128 that is <= pref and divides dim_p (dim_p % 128 == 0)."""
    t = max(128, min(pref, dim_p) // 128 * 128)
    while dim_p % t:
        t -= 128
    return t


def _tpu_config():
    """Per-generation (tm, tff, vmem_limit, megacore handling) defaults."""
    kind = ""
    try:
        kind = jax.devices()[0].device_kind.lower()
    except Exception:  # pragma: no cover - defensive: fall through to default
        pass
    if "v7" in kind:
        # 64 MiB physical VMEM per TC: leave headroom for compiler scratch.
        return {"tm": 512, "tff": 512, "vmem": 52 * 1024 * 1024,
                "two_core": True, "single_buffer_x": True}
    if "v6" in kind:
        # 128 MiB physical VMEM: big tiles -> compute bound (~1024 FLOP/B).
        return {"tm": 1024, "tff": 1024, "vmem": 100 * 1024 * 1024,
                "two_core": False, "single_buffer_x": False}
    if "v5" in kind:
        # v5 knee is ~240 FLOP/B; tm=512 is enough, but raise VMEM above the
        # 16 MiB scoped default so the larger weight slabs double-buffer.
        return {"tm": 512, "tff": 512, "vmem": 96 * 1024 * 1024,
                "two_core": False, "single_buffer_x": False}
    # Unknown generation: conservative tiles that fit everywhere.
    return {"tm": 512, "tff": 512, "vmem": 64 * 1024 * 1024,
            "two_core": False, "single_buffer_x": False}


def _ffn_kernel(x_ref, w1_ref, b1_ref, w2_ref, b2_ref, o_ref, acc_ref):
    # x_ref:  (tm, d_model)   row tile (constant across k)
    # w1_ref: (d_model, tff)  column slab of W1 for this k step
    # b1_ref: (1, tff)
    # w2_ref: (tff, d_model)  row slab of W2 for this k step
    # b2_ref: (1, d_model)
    # acc_ref: (tm, d_model)  f32 accumulator, resident across the k axis
    k = pl.program_id(1)

    h = jnp.dot(x_ref[...], w1_ref[...], preferred_element_type=jnp.float32)
    h = jnp.maximum(h + b1_ref[...].astype(jnp.float32), 0.0)   # ReLU
    # (dropout == identity at inference)
    partial = jnp.dot(h.astype(w2_ref.dtype), w2_ref[...],
                      preferred_element_type=jnp.float32)

    @pl.when(k == 0)
    def _():
        acc_ref[...] = partial            # no separate zero/broadcast init

    @pl.when(k != 0)
    def _():
        acc_ref[...] += partial

    @pl.when(k == pl.num_programs(1) - 1)
    def _():
        o_ref[...] = (acc_ref[...] + b2_ref[...].astype(jnp.float32)
                      ).astype(o_ref.dtype)


def pad_params(w1, b1, w2, b2):
    """Zero-pad FFN weights to lane-aligned (multiple-of-128) shapes.

    Call ONCE at parameter init / load time (not per forward call).  Padding
    is exact for this computation: padded W1 columns give h == 0 after ReLU,
    padded W2 rows contribute 0, padded output columns are sliced off.
    """
    d_model, d_ff = w1.shape
    d_model_p = _round_up(d_model, 128)
    d_ff_p = _round_up(d_ff, 128)
    w1p = jnp.pad(w1, ((0, d_model_p - d_model), (0, d_ff_p - d_ff)))
    b1p = jnp.pad(b1, (0, d_ff_p - d_ff)).reshape(1, d_ff_p)
    w2p = jnp.pad(w2, ((0, d_ff_p - d_ff), (0, d_model_p - d_model)))
    b2p = jnp.pad(b2, (0, d_model_p - d_model)).reshape(1, d_model_p)
    return w1p, b1p, w2p, b2p


@functools.partial(
    jax.jit,
    static_argnames=("tm", "tff", "vmem_limit_bytes",
                     "ensure_two_row_tiles", "single_buffer_x"))
def _feed_forward_impl(x, w1p, b1p, w2p, b2p, *, tm, tff, vmem_limit_bytes,
                       ensure_two_row_tiles, single_buffer_x):
    batch, seq, d_model = x.shape
    d_model_p, d_ff_p = w1p.shape
    assert w2p.shape == (d_ff_p, d_model_p), "use pad_params() on the weights"
    assert b1p.shape == (1, d_ff_p) and b2p.shape == (1, d_model_p)
    assert d_model <= d_model_p
    n = batch * seq

    # Dtype-aware sublane rounding: 8 / 16 / 32 rows for 4 / 2 / 1-byte dtypes.
    sub = 32 // jnp.dtype(x.dtype).itemsize
    tm_ = min(tm, _round_up(n, sub))
    if ensure_two_row_tiles and (n + tm_ - 1) // tm_ < 2 and n > sub:
        # Keep both v7x TensorCores busy: shrink the row tile so grid[0] >= 2.
        tm_ = _round_up((n + 1) // 2, sub)
    n_p = _round_up(n, tm_)

    tff_ = _pick_tile(d_ff_p, tff)
    grid = (n_p // tm_, d_ff_p // tff_)

    # Only the activations are padded per call; weights were padded once.
    x2d = jnp.pad(x.reshape(n, d_model),
                  ((0, n_p - n), (0, d_model_p - d_model)))

    w_item = jnp.dtype(w1p.dtype).itemsize
    x_item = jnp.dtype(x.dtype).itemsize
    weight_bytes = (w1p.size + b1p.size + w2p.size + b2p.size) * w_item
    cost = pl.CostEstimate(
        flops=4 * n_p * d_model_p * d_ff_p,
        transcendentals=0,
        # Weights are re-streamed once per row tile; x / out move once.
        bytes_accessed=grid[0] * weight_bytes + 2 * n_p * d_model_p * x_item,
    )

    if single_buffer_x:
        # x only changes once per row tile: single-buffer it to reclaim VMEM
        # for the larger tiles on v7x's tight 64 MiB budget.
        x_spec = pl.BlockSpec((tm_, d_model_p), lambda i, k: (i, 0),
                              pipeline_mode=pl.Buffered(1))
    else:
        x_spec = pl.BlockSpec((tm_, d_model_p), lambda i, k: (i, 0))

    out2d = pl.pallas_call(
        _ffn_kernel,
        out_shape=jax.ShapeDtypeStruct((n_p, d_model_p), x.dtype),
        grid_spec=pltpu.PrefetchScalarGridSpec(
            num_scalar_prefetch=0,
            grid=grid,
            in_specs=[
                x_spec,                                                # x rows
                pl.BlockSpec((d_model_p, tff_), lambda i, k: (0, k)),  # W1 cols
                pl.BlockSpec((1, tff_), lambda i, k: (0, k)),          # b1
                pl.BlockSpec((tff_, d_model_p), lambda i, k: (k, 0)),  # W2 rows
                pl.BlockSpec((1, d_model_p), lambda i, k: (0, 0)),     # b2
            ],
            out_specs=pl.BlockSpec((tm_, d_model_p), lambda i, k: (i, 0)),
            scratch_shapes=[pltpu.VMEM((tm_, d_model_p), jnp.float32)],
        ),
        compiler_params=pltpu.CompilerParams(
            dimension_semantics=("parallel", "arbitrary"),
            vmem_limit_bytes=vmem_limit_bytes,
        ),
        cost_estimate=cost,
    )(x2d, w1p, b1p, w2p, b2p)

    return out2d[:n, :d_model].reshape(batch, seq, d_model)


def feed_forward(x, w1p, b1p, w2p, b2p, *, tm=None, tff=None,
                 vmem_limit_bytes=None):
    """x: (batch, seq, d_model) -> (batch, seq, d_model).

    y = relu(x @ W1 + b1) @ W2 + b2  (eval-mode FeedForward).
    w1p/b1p/w2p/b2p must be the lane-aligned weights returned by pad_params().
    """
    cfg = _tpu_config()
    return _feed_forward_impl(
        x, w1p, b1p, w2p, b2p,
        tm=tm if tm is not None else cfg["tm"],
        tff=tff if tff is not None else cfg["tff"],
        vmem_limit_bytes=(vmem_limit_bytes if vmem_limit_bytes is not None
                          else cfg["vmem"]),
        ensure_two_row_tiles=cfg["two_core"],
        single_buffer_x=cfg["single_buffer_x"],
    )


def init_params(key, d_model, d_ff, dtype=jnp.float32):
    """Deterministic init mirroring torch.nn.Linear defaults."""
    k1, k2, k3, k4 = jax.random.split(key, 4)
    bound1 = 1.0 / (d_model ** 0.5)
    bound2 = 1.0 / (d_ff ** 0.5)
    w1 = jax.random.uniform(k1, (d_model, d_ff), dtype, -bound1, bound1)
    b1 = jax.random.uniform(k2, (d_ff,), dtype, -bound1, bound1)
    w2 = jax.random.uniform(k3, (d_ff, d_model), dtype, -bound2, bound2)
    b2 = jax.random.uniform(k4, (d_model,), dtype, -bound2, bound2)
    return w1, b1, w2, b2


if __name__ == "__main__":
    key = jax.random.PRNGKey(0)
    batch, seq, d_model, d_ff = 2, 8, 32, 64

    kx, kp = jax.random.split(key)
    x = jax.random.normal(kx, (batch, seq, d_model), jnp.float32)
    w1, b1, w2, b2 = init_params(kp, d_model, d_ff)

    # Pad the weights ONCE at init time (not in the per-call path).
    w1p, b1p, w2p, b2p = pad_params(w1, b1, w2, b2)

    out = feed_forward(x, w1p, b1p, w2p, b2p)
    jax.block_until_ready(out)

    # Pure-JAX reference (eval-mode FeedForward with ReLU activation).
    ref = jnp.maximum(x @ w1 + b1, 0.0) @ w2 + b2
    assert out.shape == x.shape
    assert jnp.allclose(out, ref, atol=1e-5, rtol=1e-5)

    print("KERNEL_OK")
</pallas_src>

<mosaic_0001>
module attributes {stable_mosaic.version = 11 : i64} {
  func.func @_ffn_kernel(%arg0: i32, %arg1: i32, %arg2: memref<16x128xf32, #tpu.memory_space<vmem>>, %arg3: memref<128x128xf32, #tpu.memory_space<vmem>>, %arg4: memref<1x128xf32, #tpu.memory_space<vmem>>, %arg5: memref<128x128xf32, #tpu.memory_space<vmem>>, %arg6: memref<1x128xf32, #tpu.memory_space<vmem>>, %arg7: memref<16x128xf32, #tpu.memory_space<vmem>>, %arg8: memref<16x128xf32, #tpu.memory_space<vmem>>) attributes {dimension_semantics = [#tpu.dimension_semantics<parallel>, #tpu.dimension_semantics<arbitrary>], iteration_bounds = array<i64: 1, 1>, scalar_prefetch = 0 : i64, scratch_operands = 1 : i64, tpu.core_type = #tpu.core_type<tc>, window_params = [{transform_indices = @transform_0, window_bounds = array<i64: 16, 128>}, {transform_indices = @transform_1, window_bounds = array<i64: 128, 128>}, {transform_indices = @transform_2, window_bounds = array<i64: 1, 128>}, {transform_indices = @transform_3, window_bounds = array<i64: 128, 128>}, {pipeline_mode = #tpu.pipeline_mode<synchronous>, transform_indices = @transform_4, window_bounds = array<i64: 1, 128>}, {transform_indices = @transform_5, window_bounds = array<i64: 16, 128>}]} {
    %c0 = arith.constant 0 : index
    %c0_0 = arith.constant 0 : index
    %0 = vector.load %arg2[%c0, %c0_0] : memref<16x128xf32, #tpu.memory_space<vmem>>, vector<16x128xf32>
    %c0_1 = arith.constant 0 : index
    %c0_2 = arith.constant 0 : index
    %1 = vector.load %arg3[%c0_1, %c0_2] : memref<128x128xf32, #tpu.memory_space<vmem>>, vector<128x128xf32>
    %cst = arith.constant dense<0.000000e+00> : vector<16x128xf32>
    %2 = tpu.matmul %0, %1, %cst {dimension_numbers = #tpu.dot_dimension_numbers<[1], [0], [0], [1], [0, 0, 1, 1], [], []>} : vector<16x128xf32>, vector<128x128xf32>, vector<16x128xf32> -> vector<16x128xf32>
    %c0_3 = arith.constant 0 : index
    %c0_4 = arith.constant 0 : index
    %3 = vector.load %arg4[%c0_3, %c0_4] : memref<1x128xf32, #tpu.memory_space<vmem>>, vector<1x128xf32>
    %4 = vector.broadcast %3 : vector<1x128xf32> to vector<16x128xf32>
    %5 = arith.addf %2, %4 : vector<16x128xf32>
    %cst_5 = arith.constant 0.000000e+00 : f32
    %6 = vector.broadcast %cst_5 : f32 to vector<16x128xf32>
    %7 = arith.maximumf %5, %6 : vector<16x128xf32>
    %c0_6 = arith.constant 0 : index
    %c0_7 = arith.constant 0 : index
    %8 = vector.load %arg5[%c0_6, %c0_7] : memref<128x128xf32, #tpu.memory_space<vmem>>, vector<128x128xf32>
    %cst_8 = arith.constant dense<0.000000e+00> : vector<16x128xf32>
    %9 = tpu.matmul %7, %8, %cst_8 {dimension_numbers = #tpu.dot_dimension_numbers<[1], [0], [0], [1], [0, 0, 1, 1], [], []>} : vector<16x128xf32>, vector<128x128xf32>, vector<16x128xf32> -> vector<16x128xf32>
    %c0_i32 = arith.constant 0 : i32
    %10 = arith.cmpi eq, %arg1, %c0_i32 : i32
    %11 = arith.extui %10 : i1 to i32
    %c0_i32_9 = arith.constant 0 : i32
    %12 = arith.cmpi ne, %11, %c0_i32_9 : i32
    scf.if %12 {
      %c0_14 = arith.constant 0 : index
      %c0_15 = arith.constant 0 : index
      %19 = vector.load %arg8[%c0_14, %c0_15] : memref<16x128xf32, #tpu.memory_space<vmem>>, vector<16x128xf32>
      tpu.vector_store %arg8[%c0_14, %c0_15], %9 {strides = array<i32>} : memref<16x128xf32, #tpu.memory_space<vmem>>, vector<16x128xf32>,
    } else {
    }
    %c0_i32_10 = arith.constant 0 : i32
    %13 = arith.cmpi ne, %arg1, %c0_i32_10 : i32
    %14 = arith.extui %13 : i1 to i32
    %c0_i32_11 = arith.constant 0 : i32
    %15 = arith.cmpi ne, %14, %c0_i32_11 : i32
    scf.if %15 {
      %c0_14 = arith.constant 0 : index
      %c0_15 = arith.constant 0 : index
      %19 = vector.load %arg8[%c0_14, %c0_15] : memref<16x128xf32, #tpu.memory_space<vmem>>, vector<16x128xf32>
      %20 = arith.addf %19, %9 : vector<16x128xf32>
      %c0_16 = arith.constant 0 : index
      %c0_17 = arith.constant 0 : index
      %21 = vector.load %arg8[%c0_16, %c0_17] : memref<16x128xf32, #tpu.memory_space<vmem>>, vector<16x128xf32>
      tpu.vector_store %arg8[%c0_16, %c0_17], %20 {strides = array<i32>} : memref<16x128xf32, #tpu.memory_space<vmem>>, vector<16x128xf32>,
    } else {
    }
    %c0_i32_12 = arith.constant 0 : i32
    %16 = arith.cmpi eq, %arg1, %c0_i32_12 : i32
    %17 = arith.extui %16 : i1 to i32
    %c0_i32_13 = arith.constant 0 : i32
    %18 = arith.cmpi ne, %17, %c0_i32_13 : i32
    scf.if %18 {
      %c0_14 = arith.constant 0 : index
      %c0_15 = arith.constant 0 : index
      %19 = vector.load %arg8[%c0_14, %c0_15] : memref<16x128xf32, #tpu.memory_space<vmem>>, vector<16x128xf32>
      %c0_16 = arith.constant 0 : index
      %c0_17 = arith.constant 0 : index
      %20 = vector.load %arg6[%c0_16, %c0_17] : memref<1x128xf32, #tpu.memory_space<vmem>>, vector<1x128xf32>
      %21 = vector.broadcast %20 : vector<1x128xf32> to vector<16x128xf32>
      %22 = arith.addf %19, %21 : vector<16x128xf32>
      %c0_18 = arith.constant 0 : index
      %c0_19 = arith.constant 0 : index
      %23 = vector.load %arg7[%c0_18, %c0_19] : memref<16x128xf32, #tpu.memory_space<vmem>>, vector<16x128xf32>
      tpu.vector_store %arg7[%c0_18, %c0_19], %22 {strides = array<i32>} : memref<16x128xf32, #tpu.memory_space<vmem>>, vector<16x128xf32>,
    } else {
    }
    return
  }
  func.func @transform_0(%arg0: i32, %arg1: i32) -> (i32, i32) {
    %c0_i32 = arith.constant 0 : i32
    %c0_i32_0 = arith.constant 0 : i32
    return %arg0, %c0_i32 : i32, i32
  }
  func.func @transform_1(%arg0: i32, %arg1: i32) -> (i32, i32) {
    %c0_i32 = arith.constant 0 : i32
    %c0_i32_0 = arith.constant 0 : i32
    return %c0_i32, %arg1 : i32, i32
  }
  func.func @transform_2(%arg0: i32, %arg1: i32) -> (i32, i32) {
    %c0_i32 = arith.constant 0 : i32
    %c0_i32_0 = arith.constant 0 : i32
    return %c0_i32, %arg1 : i32, i32
  }
  func.func @transform_3(%arg0: i32, %arg1: i32) -> (i32, i32) {
    %c0_i32 = arith.constant 0 : i32
    %c0_i32_0 = arith.constant 0 : i32
    return %arg1, %c0_i32 : i32, i32
  }
  func.func @transform_4(%arg0: i32, %arg1: i32) -> (i32, i32) {
    %c0_i32 = arith.constant 0 : i32
    %c0_i32_0 = arith.constant 0 : i32
    %c0_i32_1 = arith.constant 0 : i32
    return %c0_i32, %c0_i32_0 : i32, i32
  }
  func.func @transform_5(%arg0: i32, %arg1: i32) -> (i32, i32) {
    %c0_i32 = arith.constant 0 : i32
    %c0_i32_0 = arith.constant 0 : i32
    return %arg0, %c0_i32 : i32, i32
  }
}

</mosaic_0001>

<bundles_post_ra>
// kernel: _feed_forward_impl.1
= control target key start
LH: loop header
LB: loop body
LE: loop exit
PB: predicated region body
PF: predicated region fallthrough
CT: control target
= control target key end

     0   :  { %10 = vsyncpa [#allocation4], 0  ;;  %s493_s0 = inlined_call_operand.vmem [shape: f32[16,128], index: 0, kind: input, shape index: {}]   ;;  %s494_s1 = inlined_call_operand.hbm [shape: f32[128,128], index: 1, kind: input, shape index: {}]   ;;  %s495_s2 = inlined_call_operand.vmem [shape: f32[1,128], index: 2, kind: input, shape index: {}]   ;;  %s496_s3 = inlined_call_operand.hbm [shape: f32[128,128], index: 3, kind: input, shape index: {}]   ;;  %s497_s4 = inlined_call_operand.vmem [shape: f32[1,128], index: 4, kind: input, shape index: {}]   ;;  %s498_s5 = inlined_call_operand.vmem [shape: f32[16,128], index: 5, kind: output, shape index: {}]  }
   0x1   :  { %11 = vsyncpa [#allocation6], 0  ;;  %s435_s18 = smov [#allocation3]  }
   0x2   :  { %s19_s19 = sshll.u32 %s435_s18, 4  ;;  %s20_s19 = int_to_ptr.vmem [resolvable:$true] %s19_s19 }
   0x3   :  { %s399_s20 = scalar_lea.vmem %s20_s19, 2048  ;;  %p404_p1 = scmp.lt.s32.totalorder %s20_s19, %s20_s19 }
   0x4   :  { %p400_p0 = scmp.ne.s32.totalorder %s20_s19, %s399_s20  ;;  %p405_p2 = scmp.lt.s32.totalorder %s399_s20, %s399_s20 }
   0x6   :  { %p406_p3 = por %p405_p2, %p404_p1 }
   0x8   :  { %p407_p4 = pnand %p406_p3, %p400_p0 }
   0xa   :  { %410 = shalt.err (!%p407_p4)
}
   0xb   :  { %s436_s21 = smov 128   ;;  %s437_s22 = smov 8  }
   0xc   :  { %25 = dma.hbm_to_vmem [thread:$0]  %s494_s1, 2048, %s20_s19, [#allocation4], %s436_s21, %s436_s21, %s437_s22  }
   0xd   :  { %s438_s25 = smov [#allocation5]  }
   0xe   :  { %s33_s26 = sshll.u32 %s438_s25, 4  ;;  %s34_s26 = int_to_ptr.vmem [resolvable:$true] %s33_s26 }
   0xf   :  { %s419_s27 = scalar_lea.vmem %s34_s26, 2048  ;;  %p424_p6 = scmp.lt.s32.totalorder %s34_s26, %s34_s26 }
  0x10   :  { %p420_p5 = scmp.ne.s32.totalorder %s34_s26, %s419_s27  ;;  %p425_p7 = scmp.lt.s32.totalorder %s419_s27, %s419_s27 }
  0x12   :  { %p426_p8 = por %p425_p7, %p424_p6 }
  0x14   :  { %p427_p9 = pnand %p426_p8, %p420_p5 }
  0x16   :  { %430 = shalt.err (!%p427_p9)
}
  0x17   :  { %39 = dma.hbm_to_vmem [thread:$0]  %s496_s3, 2048, %s34_s26, [#allocation6], %s436_s21, %s436_s21, %s437_s22  }
  0x18   :  { %431 = dma.done.wait [#allocation4], 2048  }
  0x19   :  { %432 = vsyncadd [#allocation4], 4294965248 }
  0x1a   :  { %433 = dma.done.wait [#allocation6], 2048  }
  0x1b   :  { %434 = vsyncadd [#allocation6], 4294965248  ;;  %v65_v0 = vld [vmem:[#allocation3 + $0x78] sm:$0xff]  ;;  %v64_v1 = vld [vmem:[#allocation3 + $0x70] sm:$0xff] }
  0x1c   :  { %317 = vmatprep.subr.mxu0 %v65_v0  ;;  %v63_v2 = vld [vmem:[#allocation3 + $0x68] sm:$0xff]  ;;  %v62_v3 = vld [vmem:[#allocation3 + $0x60] sm:$0xff]  ;;  %v61_v5 = vld [vmem:[#allocation3 + $0x58] sm:$0xff] }
  0x1d   :  { %318 = vmatpush3.msra.mxu0 %v65_v0  ;;  %v48_v4 = vld [vmem:[%s493_s0] sm:$0xff]  ;;  %v165_v6 = vld [vmem:[#allocation5 + $0x78] sm:$0xff]  ;;  %v164_v7 = vld [vmem:[#allocation5 + $0x70] sm:$0xff] }
  0x1e   :  { %319 = vmatprep.subr.mxu0 %v64_v1  ;;  %349 = vmatprep.mubr.f32.mxu0 %v48_v4  ;;  %v60_v8 = vld [vmem:[#allocation3 + $0x50] sm:$0xff]  ;;  %v163_v9 = vld [vmem:[#allocation5 + $0x68] sm:$0xff]  ;;  %v162_v11 = vld [vmem:[#allocation5 + $0x60] sm:$0xff] }
  0x1f   :  { %320 = vmatpush3.msra.mxu0 %v64_v1  ;;  %352 = vmatprep.subr.mxu1 %v165_v6  ;;  %v59_v10 = vld [vmem:[#allocation3 + $0x48] sm:$0xff]  ;;  %v58_v12 = vld [vmem:[#allocation3 + $0x40] sm:$0xff]  ;;  %v161_v13 = vld [vmem:[#allocation5 + $0x58] sm:$0xff] }
  0x20   :  { %321 = vmatprep.subr.mxu0 %v63_v2  ;;  %353 = vmatpush3.msra.mxu1 %v165_v6  ;;  %v57_v14 = vld [vmem:[#allocation3 + $0x38] sm:$0xff]  ;;  %v160_v15 = vld [vmem:[#allocation5 + $0x50] sm:$0xff]  ;;  %v159_v17 = vld [vmem:[#allocation5 + $0x48] sm:$0xff] }
  0x21   :  { %322 = vmatpush3.msra.mxu0 %v63_v2  ;;  %354 = vmatprep.subr.mxu1 %v164_v7  ;;  %v56_v16 = vld [vmem:[#allocation3 + $0x30] sm:$0xff]  ;;  %v55_v18 = vld [vmem:[#allocation3 + $0x28] sm:$0xff]  ;;  %v158_v19 = vld [vmem:[#allocation5 + $0x40] sm:$0xff] }
  0x22   :  { %323 = vmatprep.subr.mxu0 %v62_v3  ;;  %355 = vmatpush3.msra.mxu1 %v164_v7  ;;  %v54_v20 = vld [vmem:[#allocation3 + $0x20] sm:$0xff]  ;;  %v157_v21 = vld [vmem:[#allocation5 + $0x38] sm:$0xff]  ;;  %v156_v23 = vld [vmem:[#allocation5 + $0x30] sm:$0xff] }
  0x23   :  { %324 = vmatpush3.msra.mxu0 %v62_v3  ;;  %356 = vmatprep.subr.mxu1 %v163_v9  ;;  %v53_v22 = vld [vmem:[#allocation3 + $0x18] sm:$0xff]  ;;  %v52_v24 = vld [vmem:[#allocation3 + $0x10] sm:$0xff]  ;;  %v155_v25 = vld [vmem:[#allocation5 + $0x28] sm:$0xff] }
  0x24   :  { %325 = vmatprep.subr.mxu0 %v61_v5  ;;  %357 = vmatpush3.msra.mxu1 %v163_v9  ;;  %v51_v26 = vld [vmem:[#allocation3 + $0x8] sm:$0xff]  ;;  %v154_v27 = vld [vmem:[#allocation5 + $0x20] sm:$0xff]  ;;  %v153_v30 = vld [vmem:[#allocation5 + $0x18] sm:$0xff] }
  0x25   :  { %326 = vmatpush3.msra.mxu0 %v61_v5  ;;  %358 = vmatprep.subr.mxu1 %v162_v11  ;;  %v50_v28 = vld [vmem:[#allocation3] sm:$0xff]  ;;  %v49_v29 = vld [vmem:[%s493_s0 + $0x8] sm:$0xff]  ;;  %v152_v31 = vld [vmem:[#allocation5 + $0x10] sm:$0xff] }
  0x26   :  { %327 = vmatprep.subr.mxu0 %v60_v8  ;;  %359 = vmatpush3.msra.mxu1 %v162_v11  ;;  %v151_v32 = vld [vmem:[#allocation5 + $0x8] sm:$0xff]  ;;  %v150_v33 = vld [vmem:[#allocation5] sm:$0xff] }
  0x27   :  { %328 = vmatpush3.msra.mxu0 %v60_v8  ;;  %360 = vmatprep.subr.mxu1 %v161_v13  ;;  %v279_v34 = vld [vmem:[%s495_s2] ss:$0 sm:$0xff] }
  0x28   :  { %329 = vmatprep.subr.mxu0 %v59_v10  ;;  %361 = vmatpush3.msra.mxu1 %v161_v13  ;;  %v280_v41 = vld [vmem:[%s497_s4] ss:$0 sm:$0xff] }
  0x29   :  { %330 = vmatpush3.msra.mxu0 %v59_v10  ;;  %362 = vmatprep.subr.mxu1 %v160_v15 }
  0x2a   :  { %331 = vmatprep.subr.mxu0 %v58_v12  ;;  %363 = vmatpush3.msra.mxu1 %v160_v15 }
  0x2b   :  { %332 = vmatpush3.msra.mxu0 %v58_v12  ;;  %364 = vmatprep.subr.mxu1 %v159_v17 }
  0x2c   :  { %333 = vmatprep.subr.mxu0 %v57_v14  ;;  %365 = vmatpush3.msra.mxu1 %v159_v17 }
  0x2d   :  { %334 = vmatpush3.msra.mxu0 %v57_v14  ;;  %366 = vmatprep.subr.mxu1 %v158_v19 }
  0x2e   :  { %335 = vmatprep.subr.mxu0 %v56_v16  ;;  %367 = vmatpush3.msra.mxu1 %v158_v19 }
  0x2f   :  { %336 = vmatpush3.msra.mxu0 %v56_v16  ;;  %368 = vmatprep.subr.mxu1 %v157_v21 }
  0x30   :  { %337 = vmatprep.subr.mxu0 %v55_v18  ;;  %369 = vmatpush3.msra.mxu1 %v157_v21 }
  0x31   :  { %338 = vmatpush3.msra.mxu0 %v55_v18  ;;  %370 = vmatprep.subr.mxu1 %v156_v23 }
  0x32   :  { %339 = vmatprep.subr.mxu0 %v54_v20  ;;  %371 = vmatpush3.msra.mxu1 %v156_v23 }
  0x33   :  { %340 = vmatpush3.msra.mxu0 %v54_v20  ;;  %372 = vmatprep.subr.mxu1 %v155_v25 }
  0x34   :  { %341 = vmatprep.subr.mxu0 %v53_v22  ;;  %373 = vmatpush3.msra.mxu1 %v155_v25 }
  0x35   :  { %342 = vmatpush3.msra.mxu0 %v53_v22  ;;  %374 = vmatprep.subr.mxu1 %v154_v27 }
  0x36   :  { %343 = vmatprep.subr.mxu0 %v52_v24  ;;  %375 = vmatpush3.msra.mxu1 %v154_v27 }
  0x37   :  { %344 = vmatpush3.msra.mxu0 %v52_v24  ;;  %376 = vmatprep.subr.mxu1 %v153_v30 }
  0x38   :  { %345 = vmatprep.subr.mxu0 %v51_v26  ;;  %377 = vmatpush3.msra.mxu1 %v153_v30 }
  0x39   :  { %346 = vmatpush3.msra.mxu0 %v51_v26  ;;  %378 = vmatprep.subr.mxu1 %v152_v31 }
  0x3a   :  { %347 = vmatprep.subr.mxu0 %v50_v28  ;;  %379 = vmatpush3.msra.mxu1 %v152_v31 }
  0x3b   :  { %348 = vmatpush3.msra.mxu0 %v50_v28  ;;  %380 = vmatprep.subr.mxu1 %v151_v32 }
  0x3c   :  { %350 = vmatmul.mubr.f32.vlgmr.msra.gmra.mxu0 %v49_v29  ;;  %381 = vmatpush3.msra.mxu1 %v151_v32 }
  0x3d   :  { %382 = vmatprep.subr.mxu1 %v150_v33 }
  0x3e   :  { %383 = vmatpush3.msra.mxu1 %v150_v33 }
  0xfc   :  { %v351_v35 = vpop.f32.mrf.mxu0 }
  0xfd   :  { %v145_v36 = vadd.f32 %v351_v35, %v279_v34 }
  0xfe   :  { %v139_v37 = vpop.f32.mrf.mxu0 }
  0xff   :  { %v140_v38 = vadd.f32 %v279_v34, %v139_v37  ;;  %v149_v40 = vmax.f32 %v145_v36, 0.0 }
 0x101   :  { %v148_v39 = vmax.f32 %v140_v38, 0.0 }
 0x103   :  { %384 = vmatprep.mubr.f32.mxu1 %v148_v39 }
 0x104   :  { %385 = vmatmul.mubr.f32.vlgmr.msra.gmra.mxu1 %v149_v40 }
 0x1c4   :  { %v386_v42 = vpop.f32.mrf.mxu1 }
 0x1c5   :  { %v270_v43 = vadd.f32 %v386_v42, %v280_v41 }
 0x1c6   :  { %v232_v44 = vpop.f32.mrf.mxu1 }
 0x1c7   :  { %272 = vst [vmem:[%s498_s5 + $0x8] sm:$0xff] %v270_v43  ;;  %v269_v45 = vadd.f32 %v280_v41, %v232_v44 }
 0x1c9   :  { %271 = vst [vmem:[%s498_s5] sm:$0xff] %v269_v45 }
 0x1ca   :  { %277 = vsyncpa [#allocation4], 1 }
 0x1cb   :  { %278 = vsyncpa [#allocation6], 1 }

</bundles_post_ra>
